<compile_context>
chip_gen: v5e
topology: v5e:2x2
jax: 0.10.0
libtpu: 0.0.40
codegen_flags: <defaults>
</compile_context>

<pallas_src>
import math
from functools import partial

import jax
import jax.numpy as jnp
from jax.experimental import pallas as pl
from jax.experimental.pallas import tpu as pltpu

_EPS = 1e-5                      # nn.LayerNorm default eps
_HIGH = jax.lax.Precision.HIGHEST   # used only by the f32 reference


def _layer_norm(v, g, b):
    mu = jnp.mean(v, axis=-1, keepdims=True)
    var = jnp.mean(jnp.square(v - mu), axis=-1, keepdims=True)
    return (v - mu) * jax.lax.rsqrt(var + _EPS) * g + b


def _encoder_layer_kernel(x_ref, bias_ref,
                          wq_ref, wkv_ref, wo_ref,
                          ln1_g_ref, ln1_b_ref, ln2_g_ref, ln2_b_ref,
                          w1_ref, b1_ref, w2_ref, b2_ref,
                          out_ref, *, n_head, d_key, d_value, scale, q_tile):
    x_full = x_ref[0]                                    # (S, D) f32, full sequence
    ln1_g = ln1_g_ref[...]
    ln1_b = ln1_b_ref[...]

    # --- preprocesser1 ('n') + fused K/V projection over the full sequence ---
    xn_full = _layer_norm(x_full, ln1_g, ln1_b)                         # (S, D)
    kv = jnp.dot(xn_full.astype(jnp.bfloat16), wkv_ref[...],            # (S, H*(dk+dv))
                 preferred_element_type=jnp.float32)

    # --- query rows of this tile ---------------------------------------------
    row0 = pl.multiple_of(pl.program_id(1) * q_tile, q_tile)
    xq = x_ref[0, pl.ds(row0, q_tile), :]                               # (TQ, D) residual rows
    xnq = _layer_norm(xq, ln1_g, ln1_b)                                 # (TQ, D)
    # d_model^-0.5 scale (module semantics) applied to Q, not the (TQ,S) scores.
    q_all = jnp.dot(xnq.astype(jnp.bfloat16), wq_ref[...],
                    preferred_element_type=jnp.float32) * scale         # (TQ, H*dk)

    # --- multi-head attention: per-head lane slices only for QK^T / PV -------
    # TODO(synk): for large n_head, move heads onto a fori_loop / grid axis to
    # bound live ranges.
    k_cols = n_head * d_key
    ctx_heads = []
    for h in range(n_head):
        q_h = q_all[:, h * d_key:(h + 1) * d_key].astype(jnp.bfloat16)      # (TQ, dk)
        k_h = kv[:, h * d_key:(h + 1) * d_key].astype(jnp.bfloat16)         # (S, dk)
        v_h = kv[:, k_cols + h * d_value:
                 k_cols + (h + 1) * d_value].astype(jnp.bfloat16)           # (S, dv)
        # scores = q_h @ k_h^T (contract the feature dim; no explicit transpose)
        s = jax.lax.dot_general(q_h, k_h, (((1,), (1,)), ((), ())),
                                preferred_element_type=jnp.float32)         # (TQ, S)
        s = s + bias_ref[0, h].astype(jnp.float32)
        m = jnp.max(s, axis=-1, keepdims=True)                              # XLU
        p = jnp.exp(s - m)                                                  # EUP
        inv_l = pl.reciprocal(jnp.sum(p, axis=-1, keepdims=True), approx=True)
        w = (p * inv_l).astype(jnp.bfloat16)
        ctx_heads.append(jnp.dot(w, v_h, preferred_element_type=jnp.float32))

    ctx = jnp.concatenate(ctx_heads, axis=-1).astype(jnp.bfloat16)          # (TQ, H*dv)
    attn = jnp.dot(ctx, wo_ref[...], preferred_element_type=jnp.float32)    # (TQ, D)

    # --- postprocesser1 ('da') + preprocesser2 ('n') + FFN + postprocesser2 --
    y = attn + xq
    yn = _layer_norm(y, ln2_g_ref[...], ln2_b_ref[...])
    hidden = jnp.dot(yn.astype(jnp.bfloat16), w1_ref[...],
                     preferred_element_type=jnp.float32) + b1_ref[...]
    hidden = jnp.maximum(hidden, 0.0)
    ffn = jnp.dot(hidden.astype(jnp.bfloat16), w2_ref[...],
                  preferred_element_type=jnp.float32) + b2_ref[...]
    out_ref[0] = (ffn + y).astype(out_ref.dtype)


def encoder_layer(enc_input, attn_bias, params, *, n_head, d_key, d_value,
                  q_tile=None):
    """JAX/Pallas equivalent of EncoderLayer.forward (all dropouts = 0)."""
    B, S, D = enc_input.shape
    d_inner = params["w1"].shape[1]
    dtype = enc_input.dtype

    if q_tile is None:
        q_tile = 128 if S % 128 == 0 else S
    assert S % q_tile == 0, "q_tile must divide the sequence length"
    n_qt = S // q_tile

    # bf16 weights for the MXU (f32 accumulation in-kernel); K/V weights fused.
    wq_bf = params["wq"].astype(jnp.bfloat16)                                  # (D, H*dk)
    wkv_bf = jnp.concatenate([params["wk"], params["wv"]], axis=1).astype(jnp.bfloat16)
    wo_bf = params["wo"].astype(jnp.bfloat16)                                  # (H*dv, D)
    w1_bf = params["w1"].astype(jnp.bfloat16)
    w2_bf = params["w2"].astype(jnp.bfloat16)
    # small f32 vectors, added after f32 accumulation
    ln1_g = params["ln1_g"].reshape(1, D)
    ln1_b = params["ln1_b"].reshape(1, D)
    ln2_g = params["ln2_g"].reshape(1, D)
    ln2_b = params["ln2_b"].reshape(1, D)
    b1 = params["b1"].reshape(1, d_inner)
    b2 = params["b2"].reshape(1, D)
    # bf16 bias halves the dominant HBM stream at large S
    bias_bf = attn_bias.astype(jnp.bfloat16)

    weight_args = (wq_bf, wkv_bf, wo_bf, ln1_g, ln1_b, ln2_g, ln2_b,
                   w1_bf, b1, w2_bf, b2)
    # Grid-invariant weights: whole-array, VMEM-resident, single-buffered.
    weight_spec = pl.BlockSpec(memory_space=pltpu.MemorySpace.VMEM)

    in_specs = [
        # full (S, D) slab per batch element (block index constant in qi -> DMA'd once)
        pl.BlockSpec((1, S, D), lambda b, qi: (b, 0, 0)),
        # only the (q_tile, S) bias rows needed by this step
        pl.BlockSpec((1, n_head, q_tile, S), lambda b, qi: (b, 0, qi, 0)),
    ] + [weight_spec] * len(weight_args)

    out_spec = pl.BlockSpec((1, q_tile, D), lambda b, qi: (b, qi, 0))

    flops_per_step = (
        2 * S * D * n_head * (d_key + d_value)            # fused K/V projection
        + 2 * q_tile * D * n_head * d_key                 # Q projection
        + 2 * q_tile * S * n_head * (d_key + d_value)     # QK^T and PV
        + 2 * q_tile * n_head * d_value * D               # output projection
        + 4 * q_tile * D * d_inner                        # FFN fc1 + fc2
    )
    weight_bytes = sum(int(a.size) * a.dtype.itemsize for a in weight_args)
    bytes_accessed = (B * S * D * 4                       # enc_input
                      + B * n_head * S * S * 2            # bf16 attn_bias
                      + weight_bytes
                      + B * S * D * 4)                    # output

    return pl.pallas_call(
        partial(_encoder_layer_kernel, n_head=n_head, d_key=d_key,
                d_value=d_value, scale=float(D) ** -0.5, q_tile=q_tile),
        out_shape=jax.ShapeDtypeStruct((B, S, D), dtype),
        grid=(B, n_qt),
        in_specs=in_specs,
        out_specs=out_spec,
        compiler_params=pltpu.CompilerParams(
            # batch and query-tile steps are independent -> megacore can split either
            dimension_semantics=("parallel", "parallel"),
            vmem_limit_bytes=64 * 1024 * 1024,
        ),
        cost_estimate=pl.CostEstimate(
            flops=B * n_qt * flops_per_step,
            transcendentals=B * n_qt * n_head * q_tile * (S + 1),
            bytes_accessed=int(bytes_accessed),
        ),
    )(enc_input, bias_bf, *weight_args)


# ----------------------------- reference & init -----------------------------

def init_params(key, d_model, n_head, d_key, d_value, d_inner):
    ks = jax.random.split(key, 12)

    def dense(k, fan_in, shape):
        return jax.random.normal(k, shape, jnp.float32) / math.sqrt(fan_in)

    return dict(
        ln1_g=1.0 + 0.1 * jax.random.normal(ks[0], (d_model,), jnp.float32),
        ln1_b=0.1 * jax.random.normal(ks[1], (d_model,), jnp.float32),
        wq=dense(ks[2], d_model, (d_model, n_head * d_key)),
        wk=dense(ks[3], d_model, (d_model, n_head * d_key)),
        wv=dense(ks[4], d_model, (d_model, n_head * d_value)),
        wo=dense(ks[5], n_head * d_value, (n_head * d_value, d_model)),
        ln2_g=1.0 + 0.1 * jax.random.normal(ks[6], (d_model,), jnp.float32),
        ln2_b=0.1 * jax.random.normal(ks[7], (d_model,), jnp.float32),
        w1=dense(ks[8], d_model, (d_model, d_inner)),
        b1=0.1 * jax.random.normal(ks[9], (d_inner,), jnp.float32),
        w2=dense(ks[10], d_inner, (d_inner, d_model)),
        b2=0.1 * jax.random.normal(ks[11], (d_model,), jnp.float32),
    )


def encoder_layer_reference(x, attn_bias, params, *, n_head, d_key, d_value):
    B, S, D = x.shape

    def layer_norm(v, g, b):
        mu = jnp.mean(v, axis=-1, keepdims=True)
        var = jnp.mean(jnp.square(v - mu), axis=-1, keepdims=True)
        return (v - mu) * jax.lax.rsqrt(var + _EPS) * g + b

    xn = layer_norm(x, params["ln1_g"], params["ln1_b"])
    q = jnp.matmul(xn, params["wq"], precision=_HIGH).reshape(B, S, n_head, d_key).transpose(0, 2, 1, 3)
    k = jnp.matmul(xn, params["wk"], precision=_HIGH).reshape(B, S, n_head, d_key).transpose(0, 2, 1, 3)
    v = jnp.matmul(xn, params["wv"], precision=_HIGH).reshape(B, S, n_head, d_value).transpose(0, 2, 1, 3)
    scores = jnp.einsum("bhqd,bhkd->bhqk", q, k, precision=_HIGH) * (float(D) ** -0.5) + attn_bias
    weights = jax.nn.softmax(scores, axis=-1)
    ctx = jnp.einsum("bhqk,bhkd->bhqd", weights, v, precision=_HIGH)
    ctx = ctx.transpose(0, 2, 1, 3).reshape(B, S, n_head * d_value)
    attn_out = jnp.matmul(ctx, params["wo"], precision=_HIGH) + x
    yn = layer_norm(attn_out, params["ln2_g"], params["ln2_b"])
    hidden = jax.nn.relu(jnp.matmul(yn, params["w1"], precision=_HIGH) + params["b1"])
    ffn = jnp.matmul(hidden, params["w2"], precision=_HIGH) + params["b2"]
    return ffn + attn_out


if __name__ == "__main__":
    B, S = 2, 8
    d_model = 32
    n_head = 2
    d_key = d_value = 16
    d_inner = 64

    key = jax.random.PRNGKey(0)
    k_params, k_x, k_bias = jax.random.split(key, 3)

    params = init_params(k_params, d_model, n_head, d_key, d_value, d_inner)
    enc_input = jax.random.normal(k_x, (B, S, d_model), jnp.float32)
    attn_bias = 0.5 * jax.random.normal(k_bias, (B, n_head, S, S), jnp.float32)

    out = encoder_layer(enc_input, attn_bias, params,
                        n_head=n_head, d_key=d_key, d_value=d_value)
    out = jax.block_until_ready(out)

    ref = encoder_layer_reference(enc_input, attn_bias, params,
                                  n_head=n_head, d_key=d_key, d_value=d_value)

    assert out.shape == (B, S, d_model)
    # bf16 MXU operands + bf16 bias + approx EUP reciprocal vs. a float32
    # HIGHEST-precision reference -> relaxed tolerance (per the perf review).
    max_err = float(jnp.max(jnp.abs(out - ref)))
    assert jnp.allclose(out, ref, atol=1e-1, rtol=1e-1), f"max abs err = {max_err}"

    print("KERNEL_OK")
</pallas_src>

<mosaic_0001>
module attributes {stable_mosaic.version = 11 : i64} {
  func.func @_encoder_layer_kernel(%arg0: i32, %arg1: i32, %arg2: memref<1x8x32xf32, #tpu.memory_space<vmem>>, %arg3: memref<1x2x8x8xbf16, #tpu.memory_space<vmem>>, %arg4: memref<32x32xbf16, #tpu.memory_space<vmem>>, %arg5: memref<32x64xbf16, #tpu.memory_space<vmem>>, %arg6: memref<32x32xbf16, #tpu.memory_space<vmem>>, %arg7: memref<1x32xf32, #tpu.memory_space<vmem>>, %arg8: memref<1x32xf32, #tpu.memory_space<vmem>>, %arg9: memref<1x32xf32, #tpu.memory_space<vmem>>, %arg10: memref<1x32xf32, #tpu.memory_space<vmem>>, %arg11: memref<32x64xbf16, #tpu.memory_space<vmem>>, %arg12: memref<1x64xf32, #tpu.memory_space<vmem>>, %arg13: memref<64x32xbf16, #tpu.memory_space<vmem>>, %arg14: memref<1x32xf32, #tpu.memory_space<vmem>>, %arg15: memref<1x8x32xf32, #tpu.memory_space<vmem>>) attributes {dimension_semantics = [#tpu.dimension_semantics<parallel>, #tpu.dimension_semantics<parallel>], iteration_bounds = array<i64: 2, 1>, scalar_prefetch = 0 : i64, scratch_operands = 0 : i64, tpu.core_type = #tpu.core_type<tc>, window_params = [{transform_indices = @transform_0, window_bounds = array<i64: 1, 8, 32>}, {transform_indices = @transform_1, window_bounds = array<i64: 1, 2, 8, 8>}, {pipeline_mode = #tpu.pipeline_mode<synchronous>, transform_indices = @transform_2, window_bounds = array<i64: 32, 32>}, {pipeline_mode = #tpu.pipeline_mode<synchronous>, transform_indices = @transform_3, window_bounds = array<i64: 32, 64>}, {pipeline_mode = #tpu.pipeline_mode<synchronous>, transform_indices = @transform_4, window_bounds = array<i64: 32, 32>}, {pipeline_mode = #tpu.pipeline_mode<synchronous>, transform_indices = @transform_5, window_bounds = array<i64: 1, 32>}, {pipeline_mode = #tpu.pipeline_mode<synchronous>, transform_indices = @transform_6, window_bounds = array<i64: 1, 32>}, {pipeline_mode = #tpu.pipeline_mode<synchronous>, transform_indices = @transform_7, window_bounds = array<i64: 1, 32>}, {pipeline_mode = #tpu.pipeline_mode<synchronous>, transform_indices = @transform_8, window_bounds = array<i64: 1, 32>}, {pipeline_mode = #tpu.pipeline_mode<synchronous>, transform_indices = @transform_9, window_bounds = array<i64: 32, 64>}, {pipeline_mode = #tpu.pipeline_mode<synchronous>, transform_indices = @transform_10, window_bounds = array<i64: 1, 64>}, {pipeline_mode = #tpu.pipeline_mode<synchronous>, transform_indices = @transform_11, window_bounds = array<i64: 64, 32>}, {pipeline_mode = #tpu.pipeline_mode<synchronous>, transform_indices = @transform_12, window_bounds = array<i64: 1, 32>}, {transform_indices = @transform_13, window_bounds = array<i64: 1, 8, 32>}]} {
    %c0 = arith.constant 0 : index
    %c0_0 = arith.constant 0 : index
    %c0_1 = arith.constant 0 : index
    %0 = vector.load %arg2[%c0, %c0_0, %c0_1] : memref<1x8x32xf32, #tpu.memory_space<vmem>>, vector<1x8x32xf32>
    %1 = vector.shape_cast %0 : vector<1x8x32xf32> to vector<8x32xf32>
    %c0_2 = arith.constant 0 : index
    %c0_3 = arith.constant 0 : index
    %2 = vector.load %arg7[%c0_2, %c0_3] : memref<1x32xf32, #tpu.memory_space<vmem>>, vector<1x32xf32>
    %c0_4 = arith.constant 0 : index
    %c0_5 = arith.constant 0 : index
    %3 = vector.load %arg8[%c0_4, %c0_5] : memref<1x32xf32, #tpu.memory_space<vmem>>, vector<1x32xf32>
    %cst = arith.constant dense<0.000000e+00> : vector<8xf32>
    %4 = vector.multi_reduction <add>, %1, %cst [1] : vector<8x32xf32> to vector<8xf32>
    %5 = vector.shape_cast %4 : vector<8xf32> to vector<8x1xf32>
    %cst_6 = arith.constant 3.200000e+01 : f32
    %6 = vector.broadcast %cst_6 : f32 to vector<8x1xf32>
    %7 = arith.divf %5, %6 : vector<8x1xf32>
    %8 = vector.broadcast %7 : vector<8x1xf32> to vector<8x32xf32>
    %9 = arith.subf %1, %8 : vector<8x32xf32>
    %10 = arith.mulf %9, %9 : vector<8x32xf32>
    %cst_7 = arith.constant dense<0.000000e+00> : vector<8xf32>
    %11 = vector.multi_reduction <add>, %10, %cst_7 [1] : vector<8x32xf32> to vector<8xf32>
    %12 = vector.shape_cast %11 : vector<8xf32> to vector<8x1xf32>
    %cst_8 = arith.constant 3.200000e+01 : f32
    %13 = vector.broadcast %cst_8 : f32 to vector<8x1xf32>
    %14 = arith.divf %12, %13 : vector<8x1xf32>
    %15 = vector.broadcast %7 : vector<8x1xf32> to vector<8x32xf32>
    %16 = arith.subf %1, %15 : vector<8x32xf32>
    %cst_9 = arith.constant 9.99999974E-6 : f32
    %17 = vector.broadcast %cst_9 : f32 to vector<8x1xf32>
    %18 = arith.addf %14, %17 : vector<8x1xf32>
    %19 = math.rsqrt %18 : vector<8x1xf32>
    %20 = vector.broadcast %19 : vector<8x1xf32> to vector<8x32xf32>
    %21 = arith.mulf %16, %20 : vector<8x32xf32>
    %22 = vector.broadcast %2 : vector<1x32xf32> to vector<8x32xf32>
    %23 = arith.mulf %21, %22 : vector<8x32xf32>
    %24 = vector.broadcast %3 : vector<1x32xf32> to vector<8x32xf32>
    %25 = arith.addf %23, %24 : vector<8x32xf32>
    %26 = arith.truncf %25 : vector<8x32xf32> to vector<8x32xbf16>
    %c0_10 = arith.constant 0 : index
    %c0_11 = arith.constant 0 : index
    %27 = vector.load %arg5[%c0_10, %c0_11] : memref<32x64xbf16, #tpu.memory_space<vmem>>, vector<32x64xbf16>
    %cst_12 = arith.constant dense<0.000000e+00> : vector<8x64xf32>
    %28 = tpu.matmul %26, %27, %cst_12 {dimension_numbers = #tpu.dot_dimension_numbers<[1], [0], [0], [1], [0, 0, 1, 1], [], []>} : vector<8x32xbf16>, vector<32x64xbf16>, vector<8x64xf32> -> vector<8x64xf32>
    %c8_i32 = arith.constant 8 : i32
    %29 = arith.muli %arg1, %c8_i32 : i32
    %30 = tpu.assume_multiple %29, 8 : i32
    %c0_13 = arith.constant 0 : index
    %31 = arith.index_cast %30 : i32 to index
    %c0_14 = arith.constant 0 : index
    %32 = vector.load %arg2[%c0_13, %31, %c0_14] : memref<1x8x32xf32, #tpu.memory_space<vmem>>, vector<1x8x32xf32>
    %33 = vector.shape_cast %32 : vector<1x8x32xf32> to vector<8x32xf32>
    %cst_15 = arith.constant dense<0.000000e+00> : vector<8xf32>
    %34 = vector.multi_reduction <add>, %33, %cst_15 [1] : vector<8x32xf32> to vector<8xf32>
    %35 = vector.shape_cast %34 : vector<8xf32> to vector<8x1xf32>
    %cst_16 = arith.constant 3.200000e+01 : f32
    %36 = vector.broadcast %cst_16 : f32 to vector<8x1xf32>
    %37 = arith.divf %35, %36 : vector<8x1xf32>
    %38 = vector.broadcast %37 : vector<8x1xf32> to vector<8x32xf32>
    %39 = arith.subf %33, %38 : vector<8x32xf32>
    %40 = arith.mulf %39, %39 : vector<8x32xf32>
    %cst_17 = arith.constant dense<0.000000e+00> : vector<8xf32>
    %41 = vector.multi_reduction <add>, %40, %cst_17 [1] : vector<8x32xf32> to vector<8xf32>
    %42 = vector.shape_cast %41 : vector<8xf32> to vector<8x1xf32>
    %cst_18 = arith.constant 3.200000e+01 : f32
    %43 = vector.broadcast %cst_18 : f32 to vector<8x1xf32>
    %44 = arith.divf %42, %43 : vector<8x1xf32>
    %45 = vector.broadcast %37 : vector<8x1xf32> to vector<8x32xf32>
    %46 = arith.subf %33, %45 : vector<8x32xf32>
    %cst_19 = arith.constant 9.99999974E-6 : f32
    %47 = vector.broadcast %cst_19 : f32 to vector<8x1xf32>
    %48 = arith.addf %44, %47 : vector<8x1xf32>
    %49 = math.rsqrt %48 : vector<8x1xf32>
    %50 = vector.broadcast %49 : vector<8x1xf32> to vector<8x32xf32>
    %51 = arith.mulf %46, %50 : vector<8x32xf32>
    %52 = vector.broadcast %2 : vector<1x32xf32> to vector<8x32xf32>
    %53 = arith.mulf %51, %52 : vector<8x32xf32>
    %54 = vector.broadcast %3 : vector<1x32xf32> to vector<8x32xf32>
    %55 = arith.addf %53, %54 : vector<8x32xf32>
    %56 = arith.truncf %55 : vector<8x32xf32> to vector<8x32xbf16>
    %c0_20 = arith.constant 0 : index
    %c0_21 = arith.constant 0 : index
    %57 = vector.load %arg4[%c0_20, %c0_21] : memref<32x32xbf16, #tpu.memory_space<vmem>>, vector<32x32xbf16>
    %cst_22 = arith.constant dense<0.000000e+00> : vector<8x32xf32>
    %58 = tpu.matmul %56, %57, %cst_22 {dimension_numbers = #tpu.dot_dimension_numbers<[1], [0], [0], [1], [0, 0, 1, 1], [], []>} : vector<8x32xbf16>, vector<32x32xbf16>, vector<8x32xf32> -> vector<8x32xf32>
    %cst_23 = arith.constant 0.176776692 : f32
    %59 = vector.broadcast %cst_23 : f32 to vector<8x32xf32>
    %60 = arith.mulf %58, %59 : vector<8x32xf32>
    %61 = vector.extract_strided_slice %60 {offsets = [0, 0], sizes = [8, 16], strides = [1, 1]} : vector<8x32xf32> to vector<8x16xf32>
    %62 = arith.truncf %61 : vector<8x16xf32> to vector<8x16xbf16>
    %63 = vector.extract_strided_slice %28 {offsets = [0, 0], sizes = [8, 16], strides = [1, 1]} : vector<8x64xf32> to vector<8x16xf32>
    %64 = arith.truncf %63 : vector<8x16xf32> to vector<8x16xbf16>
    %65 = vector.extract_strided_slice %28 {offsets = [0, 32], sizes = [8, 16], strides = [1, 1]} : vector<8x64xf32> to vector<8x16xf32>
    %66 = arith.truncf %65 : vector<8x16xf32> to vector<8x16xbf16>
    %cst_24 = arith.constant dense<0.000000e+00> : vector<8x8xf32>
    %67 = tpu.matmul %62, %64, %cst_24 {dimension_numbers = #tpu.dot_dimension_numbers<[1], [1], [0], [0], [0, 0, 1, 0], [], []>} : vector<8x16xbf16>, vector<8x16xbf16>, vector<8x8xf32> -> vector<8x8xf32>
    %c0_25 = arith.constant 0 : index
    %c0_26 = arith.constant 0 : index
    %c0_27 = arith.constant 0 : index
    %c0_28 = arith.constant 0 : index
    %68 = vector.load %arg3[%c0_25, %c0_26, %c0_27, %c0_28] : memref<1x2x8x8xbf16, #tpu.memory_space<vmem>>, vector<1x1x8x8xbf16>
    %69 = vector.shape_cast %68 : vector<1x1x8x8xbf16> to vector<8x8xbf16>
    %70 = arith.extf %69 : vector<8x8xbf16> to vector<8x8xf32>
    %71 = arith.addf %67, %70 : vector<8x8xf32>
    %cst_29 = arith.constant dense<0xFF800000> : vector<8xf32>
    %72 = vector.multi_reduction <maximumf>, %71, %cst_29 [1] : vector<8x8xf32> to vector<8xf32>
    %73 = vector.shape_cast %72 : vector<8xf32> to vector<8x1xf32>
    %74 = vector.broadcast %73 : vector<8x1xf32> to vector<8x8xf32>
    %75 = arith.subf %71, %74 : vector<8x8xf32>
    %76 = math.exp %75 : vector<8x8xf32>
    %cst_30 = arith.constant dense<0.000000e+00> : vector<8xf32>
    %77 = vector.multi_reduction <add>, %76, %cst_30 [1] : vector<8x8xf32> to vector<8xf32>
    %78 = vector.shape_cast %77 : vector<8xf32> to vector<8x1xf32>
    %79 = tpu.reciprocal %78 {approx = true} : vector<8x1xf32> -> vector<8x1xf32>
    %80 = vector.broadcast %79 : vector<8x1xf32> to vector<8x8xf32>
    %81 = arith.mulf %76, %80 : vector<8x8xf32>
    %82 = arith.truncf %81 : vector<8x8xf32> to vector<8x8xbf16>
    %cst_31 = arith.constant dense<0.000000e+00> : vector<8x16xf32>
    %83 = tpu.matmul %82, %66, %cst_31 {dimension_numbers = #tpu.dot_dimension_numbers<[1], [0], [0], [1], [0, 0, 1, 1], [], []>} : vector<8x8xbf16>, vector<8x16xbf16>, vector<8x16xf32> -> vector<8x16xf32>
    %84 = vector.extract_strided_slice %60 {offsets = [0, 16], sizes = [8, 16], strides = [1, 1]} : vector<8x32xf32> to vector<8x16xf32>
    %85 = arith.truncf %84 : vector<8x16xf32> to vector<8x16xbf16>
    %86 = vector.extract_strided_slice %28 {offsets = [0, 16], sizes = [8, 16], strides = [1, 1]} : vector<8x64xf32> to vector<8x16xf32>
    %87 = arith.truncf %86 : vector<8x16xf32> to vector<8x16xbf16>
    %88 = vector.extract_strided_slice %28 {offsets = [0, 48], sizes = [8, 16], strides = [1, 1]} : vector<8x64xf32> to vector<8x16xf32>
    %89 = arith.truncf %88 : vector<8x16xf32> to vector<8x16xbf16>
    %cst_32 = arith.constant dense<0.000000e+00> : vector<8x8xf32>
    %90 = tpu.matmul %85, %87, %cst_32 {dimension_numbers = #tpu.dot_dimension_numbers<[1], [1], [0], [0], [0, 0, 1, 0], [], []>} : vector<8x16xbf16>, vector<8x16xbf16>, vector<8x8xf32> -> vector<8x8xf32>
    %c0_33 = arith.constant 0 : index
    %c1 = arith.constant 1 : index
    %c0_34 = arith.constant 0 : index
    %c0_35 = arith.constant 0 : index
    %91 = vector.load %arg3[%c0_33, %c1, %c0_34, %c0_35] : memref<1x2x8x8xbf16, #tpu.memory_space<vmem>>, vector<1x1x8x8xbf16>
    %92 = vector.shape_cast %91 : vector<1x1x8x8xbf16> to vector<8x8xbf16>
    %93 = arith.extf %92 : vector<8x8xbf16> to vector<8x8xf32>
    %94 = arith.addf %90, %93 : vector<8x8xf32>
    %cst_36 = arith.constant dense<0xFF800000> : vector<8xf32>
    %95 = vector.multi_reduction <maximumf>, %94, %cst_36 [1] : vector<8x8xf32> to vector<8xf32>
    %96 = vector.shape_cast %95 : vector<8xf32> to vector<8x1xf32>
    %97 = vector.broadcast %96 : vector<8x1xf32> to vector<8x8xf32>
    %98 = arith.subf %94, %97 : vector<8x8xf32>
    %99 = math.exp %98 : vector<8x8xf32>
    %cst_37 = arith.constant dense<0.000000e+00> : vector<8xf32>
    %100 = vector.multi_reduction <add>, %99, %cst_37 [1] : vector<8x8xf32> to vector<8xf32>
    %101 = vector.shape_cast %100 : vector<8xf32> to vector<8x1xf32>
    %102 = tpu.reciprocal %101 {approx = true} : vector<8x1xf32> -> vector<8x1xf32>
    %103 = vector.broadcast %102 : vector<8x1xf32> to vector<8x8xf32>
    %104 = arith.mulf %99, %103 : vector<8x8xf32>
    %105 = arith.truncf %104 : vector<8x8xf32> to vector<8x8xbf16>
    %cst_38 = arith.constant dense<0.000000e+00> : vector<8x16xf32>
    %106 = tpu.matmul %105, %89, %cst_38 {dimension_numbers = #tpu.dot_dimension_numbers<[1], [0], [0], [1], [0, 0, 1, 1], [], []>} : vector<8x8xbf16>, vector<8x16xbf16>, vector<8x16xf32> -> vector<8x16xf32>
    %107 = tpu.concatenate %83, %106 in 1 : vector<8x16xf32>, vector<8x16xf32> -> vector<8x32xf32>
    %108 = arith.truncf %107 : vector<8x32xf32> to vector<8x32xbf16>
    %c0_39 = arith.constant 0 : index
    %c0_40 = arith.constant 0 : index
    %109 = vector.load %arg6[%c0_39, %c0_40] : memref<32x32xbf16, #tpu.memory_space<vmem>>, vector<32x32xbf16>
    %cst_41 = arith.constant dense<0.000000e+00> : vector<8x32xf32>
    %110 = tpu.matmul %108, %109, %cst_41 {dimension_numbers = #tpu.dot_dimension_numbers<[1], [0], [0], [1], [0, 0, 1, 1], [], []>} : vector<8x32xbf16>, vector<32x32xbf16>, vector<8x32xf32> -> vector<8x32xf32>
    %111 = arith.addf %110, %33 : vector<8x32xf32>
    %c0_42 = arith.constant 0 : index
    %c0_43 = arith.constant 0 : index
    %112 = vector.load %arg9[%c0_42, %c0_43] : memref<1x32xf32, #tpu.memory_space<vmem>>, vector<1x32xf32>
    %c0_44 = arith.constant 0 : index
    %c0_45 = arith.constant 0 : index
    %113 = vector.load %arg10[%c0_44, %c0_45] : memref<1x32xf32, #tpu.memory_space<vmem>>, vector<1x32xf32>
    %cst_46 = arith.constant dense<0.000000e+00> : vector<8xf32>
    %114 = vector.multi_reduction <add>, %111, %cst_46 [1] : vector<8x32xf32> to vector<8xf32>
    %115 = vector.shape_cast %114 : vector<8xf32> to vector<8x1xf32>
    %cst_47 = arith.constant 3.200000e+01 : f32
    %116 = vector.broadcast %cst_47 : f32 to vector<8x1xf32>
    %117 = arith.divf %115, %116 : vector<8x1xf32>
    %118 = vector.broadcast %117 : vector<8x1xf32> to vector<8x32xf32>
    %119 = arith.subf %111, %118 : vector<8x32xf32>
    %120 = arith.mulf %119, %119 : vector<8x32xf32>
    %cst_48 = arith.constant dense<0.000000e+00> : vector<8xf32>
    %121 = vector.multi_reduction <add>, %120, %cst_48 [1] : vector<8x32xf32> to vector<8xf32>
    %122 = vector.shape_cast %121 : vector<8xf32> to vector<8x1xf32>
    %cst_49 = arith.constant 3.200000e+01 : f32
    %123 = vector.broadcast %cst_49 : f32 to vector<8x1xf32>
    %124 = arith.divf %122, %123 : vector<8x1xf32>
    %125 = vector.broadcast %117 : vector<8x1xf32> to vector<8x32xf32>
    %126 = arith.subf %111, %125 : vector<8x32xf32>
    %cst_50 = arith.constant 9.99999974E-6 : f32
    %127 = vector.broadcast %cst_50 : f32 to vector<8x1xf32>
    %128 = arith.addf %124, %127 : vector<8x1xf32>
    %129 = math.rsqrt %128 : vector<8x1xf32>
    %130 = vector.broadcast %129 : vector<8x1xf32> to vector<8x32xf32>
    %131 = arith.mulf %126, %130 : vector<8x32xf32>
    %132 = vector.broadcast %112 : vector<1x32xf32> to vector<8x32xf32>
    %133 = arith.mulf %131, %132 : vector<8x32xf32>
    %134 = vector.broadcast %113 : vector<1x32xf32> to vector<8x32xf32>
    %135 = arith.addf %133, %134 : vector<8x32xf32>
    %136 = arith.truncf %135 : vector<8x32xf32> to vector<8x32xbf16>
    %c0_51 = arith.constant 0 : index
    %c0_52 = arith.constant 0 : index
    %137 = vector.load %arg11[%c0_51, %c0_52] : memref<32x64xbf16, #tpu.memory_space<vmem>>, vector<32x64xbf16>
    %cst_53 = arith.constant dense<0.000000e+00> : vector<8x64xf32>
    %138 = tpu.matmul %136, %137, %cst_53 {dimension_numbers = #tpu.dot_dimension_numbers<[1], [0], [0], [1], [0, 0, 1, 1], [], []>} : vector<8x32xbf16>, vector<32x64xbf16>, vector<8x64xf32> -> vector<8x64xf32>
    %c0_54 = arith.constant 0 : index
    %c0_55 = arith.constant 0 : index
    %139 = vector.load %arg12[%c0_54, %c0_55] : memref<1x64xf32, #tpu.memory_space<vmem>>, vector<1x64xf32>
    %140 = vector.broadcast %139 : vector<1x64xf32> to vector<8x64xf32>
    %141 = arith.addf %138, %140 : vector<8x64xf32>
    %cst_56 = arith.constant 0.000000e+00 : f32
    %142 = vector.broadcast %cst_56 : f32 to vector<8x64xf32>
    %143 = arith.maximumf %141, %142 : vector<8x64xf32>
    %144 = arith.truncf %143 : vector<8x64xf32> to vector<8x64xbf16>
    %c0_57 = arith.constant 0 : index
    %c0_58 = arith.constant 0 : index
    %145 = vector.load %arg13[%c0_57, %c0_58] : memref<64x32xbf16, #tpu.memory_space<vmem>>, vector<64x32xbf16>
    %cst_59 = arith.constant dense<0.000000e+00> : vector<8x32xf32>
    %146 = tpu.matmul %144, %145, %cst_59 {dimension_numbers = #tpu.dot_dimension_numbers<[1], [0], [0], [1], [0, 0, 1, 1], [], []>} : vector<8x64xbf16>, vector<64x32xbf16>, vector<8x32xf32> -> vector<8x32xf32>
    %c0_60 = arith.constant 0 : index
    %c0_61 = arith.constant 0 : index
    %147 = vector.load %arg14[%c0_60, %c0_61] : memref<1x32xf32, #tpu.memory_space<vmem>>, vector<1x32xf32>
    %148 = vector.broadcast %147 : vector<1x32xf32> to vector<8x32xf32>
    %149 = arith.addf %146, %148 : vector<8x32xf32>
    %150 = arith.addf %149, %111 : vector<8x32xf32>
    %c0_62 = arith.constant 0 : index
    %c0_63 = arith.constant 0 : index
    %c0_64 = arith.constant 0 : index
    %151 = vector.load %arg15[%c0_62, %c0_63, %c0_64] : memref<1x8x32xf32, #tpu.memory_space<vmem>>, vector<1x8x32xf32>
    %152 = vector.shape_cast %151 : vector<1x8x32xf32> to vector<8x32xf32>
    %153 = vector.shape_cast %150 : vector<8x32xf32> to vector<1x8x32xf32>
    tpu.vector_store %arg15[%c0_62, %c0_63, %c0_64], %153 {strides = array<i32>} : memref<1x8x32xf32, #tpu.memory_space<vmem>>, vector<1x8x32xf32>,
    return
  }
  func.func @transform_0(%arg0: i32, %arg1: i32) -> (i32, i32, i32) {
    %c0_i32 = arith.constant 0 : i32
    %c0_i32_0 = arith.constant 0 : i32
    %c0_i32_1 = arith.constant 0 : i32
    return %arg0, %c0_i32, %c0_i32_0 : i32, i32, i32
  }
  func.func @transform_1(%arg0: i32, %arg1: i32) -> (i32, i32, i32, i32) {
    %c0_i32 = arith.constant 0 : i32
    %c0_i32_0 = arith.constant 0 : i32
    %c0_i32_1 = arith.constant 0 : i32
    return %arg0, %c0_i32, %arg1, %c0_i32_0 : i32, i32, i32, i32
  }
  func.func @transform_2(%arg0: i32, %arg1: i32) -> (i32, i32) {
    %c0_i32 = arith.constant 0 : i32
    %c0_i32_0 = arith.constant 0 : i32
    %c0_i32_1 = arith.constant 0 : i32
    return %c0_i32, %c0_i32_0 : i32, i32
  }
  func.func @transform_3(%arg0: i32, %arg1: i32) -> (i32, i32) {
    %c0_i32 = arith.constant 0 : i32
    %c0_i32_0 = arith.constant 0 : i32
    %c0_i32_1 = arith.constant 0 : i32
    return %c0_i32, %c0_i32_0 : i32, i32
  }
  func.func @transform_4(%arg0: i32, %arg1: i32) -> (i32, i32) {
    %c0_i32 = arith.constant 0 : i32
    %c0_i32_0 = arith.constant 0 : i32
    %c0_i32_1 = arith.constant 0 : i32
    return %c0_i32, %c0_i32_0 : i32, i32
  }
  func.func @transform_5(%arg0: i32, %arg1: i32) -> (i32, i32) {
    %c0_i32 = arith.constant 0 : i32
    %c0_i32_0 = arith.constant 0 : i32
    %c0_i32_1 = arith.constant 0 : i32
    return %c0_i32, %c0_i32_0 : i32, i32
  }
  func.func @transform_6(%arg0: i32, %arg1: i32) -> (i32, i32) {
    %c0_i32 = arith.constant 0 : i32
    %c0_i32_0 = arith.constant 0 : i32
    %c0_i32_1 = arith.constant 0 : i32
    return %c0_i32, %c0_i32_0 : i32, i32
  }
  func.func @transform_7(%arg0: i32, %arg1: i32) -> (i32, i32) {
    %c0_i32 = arith.constant 0 : i32
    %c0_i32_0 = arith.constant 0 : i32
    %c0_i32_1 = arith.constant 0 : i32
    return %c0_i32, %c0_i32_0 : i32, i32
  }
  func.func @transform_8(%arg0: i32, %arg1: i32) -> (i32, i32) {
    %c0_i32 = arith.constant 0 : i32
    %c0_i32_0 = arith.constant 0 : i32
    %c0_i32_1 = arith.constant 0 : i32
    return %c0_i32, %c0_i32_0 : i32, i32
  }
  func.func @transform_9(%arg0: i32, %arg1: i32) -> (i32, i32) {
    %c0_i32 = arith.constant 0 : i32
    %c0_i32_0 = arith.constant 0 : i32
    %c0_i32_1 = arith.constant 0 : i32
    return %c0_i32, %c0_i32_0 : i32, i32
  }
  func.func @transform_10(%arg0: i32, %arg1: i32) -> (i32, i32) {
    %c0_i32 = arith.constant 0 : i32
    %c0_i32_0 = arith.constant 0 : i32
    %c0_i32_1 = arith.constant 0 : i32
    return %c0_i32, %c0_i32_0 : i32, i32
  }
  func.func @transform_11(%arg0: i32, %arg1: i32) -> (i32, i32) {
    %c0_i32 = arith.constant 0 : i32
    %c0_i32_0 = arith.constant 0 : i32
    %c0_i32_1 = arith.constant 0 : i32
    return %c0_i32, %c0_i32_0 : i32, i32
  }
  func.func @transform_12(%arg0: i32, %arg1: i32) -> (i32, i32) {
    %c0_i32 = arith.constant 0 : i32
    %c0_i32_0 = arith.constant 0 : i32
    %c0_i32_1 = arith.constant 0 : i32
    return %c0_i32, %c0_i32_0 : i32, i32
  }
  func.func @transform_13(%arg0: i32, %arg1: i32) -> (i32, i32, i32) {
    %c0_i32 = arith.constant 0 : i32
    %c0_i32_0 = arith.constant 0 : i32
    return %arg0, %arg1, %c0_i32 : i32, i32, i32
  }
}

</mosaic_0001>

<bundles_post_ra>
// kernel: tpu_custom_call.1
= control target key start
LH: loop header
LB: loop body
LE: loop exit
PB: predicated region body
PF: predicated region fallthrough
CT: control target
= control target key end

     0   :  { %s1771_s0 = inlined_call_operand.vmem [shape: f32[2,8,32], index: 0, kind: input, shape index: {}]   ;;  %s1772_s1 = inlined_call_operand.vmem [shape: bf16[2,2,8,8], index: 1, kind: input, shape index: {}]   ;;  %s1773_s2 = inlined_call_operand.vmem [shape: bf16[32,32], index: 2, kind: input, shape index: {}]   ;;  %s1774_s3 = inlined_call_operand.hbm [shape: bf16[32,64], index: 3, kind: input, shape index: {}]   ;;  %s1775_s4 = inlined_call_operand.hbm [shape: bf16[32,32], index: 4, kind: input, shape index: {}]   ;;  %s1776_s5 = inlined_call_operand.vmem [shape: f32[1,32], index: 5, kind: input, shape index: {}]   ;;  %s1777_s6 = inlined_call_operand.vmem [shape: f32[1,32], index: 6, kind: input, shape index: {}]   ;;  %s1778_s7 = inlined_call_operand.vmem [shape: f32[1,32], index: 7, kind: input, shape index: {}]   ;;  %s1779_s8 = inlined_call_operand.vmem [shape: f32[1,32], index: 8, kind: input, shape index: {}]   ;;  %s1780_s9 = inlined_call_operand.hbm [shape: bf16[32,64], index: 9, kind: input, shape index: {}]   ;;  %s1781_s10 = inlined_call_operand.vmem [shape: f32[1,64], index: 10, kind: input, shape index: {}]   ;;  %s1782_s11 = inlined_call_operand.vmem [shape: bf16[64,32], index: 11, kind: input, shape index: {}]   ;;  %s1783_s12 = inlined_call_operand.vmem [shape: f32[1,32], index: 12, kind: input, shape index: {}]   ;;  %s1784_s13 = inlined_call_operand.hbm [shape: f32[2,8,32], index: 13, kind: output, shape index: {}]  }
   0x1   :  { %1795 = sst [smem:[#allocation20_spill]] %s1775_s4 }
   0x2   :  { %1796 = sst [smem:[#allocation21_spill]] %s1784_s13 }
   0x3   :  { %18 = vsyncpa [#allocation3], 0 }
   0x4   :  { %19 = vsyncpa [#allocation6], 0 }
   0x5   :  { %20 = vsyncpa [#allocation4], 0 }
   0x6   :  { %22 = vsyncpa [#allocation4 + $0x1], 0  ;;  %s1550_s25 = smov 0   ;;  %s1552_s26 = smov 0  }
   0x7   :  { %s1554_s27 = smov 0   ;;  %s1556_s28 = smov 0  }
   0x8   :  { %s1558_s29 = smov 0   ;;  %s1560_s30 = smov 0  }
   0x9 LB: > { %1797 = sst [smem:[#allocation12_spill]] %s1448_s25  ;;  %s1087_s14 = sadd.s32 4294967295, %s1468_s30   ;;  %s1468_s30 = sphi %s1560_s30, %s28_s30   ;;  %s1464_s29 = sphi %s1558_s29, %s1819_s29   ;;  %s1460_s28 = sphi %s1556_s28, %s1818_s28   ;;  %s1456_s27 = sphi %s1554_s27, %s1817_s27   ;;  %s1452_s26 = sphi %s1552_s26, %s1821_s26   ;;  %s1448_s25 = sphi %s1550_s25, %s1820_s25  }
   0xa   : > { %1798 = sst [smem:[#allocation13_spill]] %s1456_s27  ;;  %s1088_s15 = sadd.s32 4294967294, %s1468_s30  }
   0xb   : > { %1799 = sst [smem:[#allocation14_spill]] %s1464_s29  ;;  %s40_s16 = sadd.s32 1, %s1464_s29 }
   0xc   : > { %1800 = sst [smem:[#allocation15_spill]] %s1468_s30  ;;  %s334_s17 = sadd.s32 1, %s1456_s27 }
   0xd   : > { %p42_p0 = scmp.ge.s32.totalorder %s40_s16, 2  ;;  %p344_p1 = scmp.ne.s32.totalorder %s1456_s27, %s1452_s26 }
   0xe   : > { %p345_p2 = scmp.eq.s32.totalorder %s1087_s14, 1  ;;  %p350_p3 = scmp.ne.s32.totalorder %s1452_s26, %s1448_s25 }
   0xf   : > { %s1823_s16 = smov (%p42_p0, %s40_s16), 0  ;;  %p351_p5 = scmp.eq.s32.totalorder %s1088_s15, 1 }
  0x10   : > { %1801 = sst [smem:[#allocation16_spill]] %s1823_s16  ;;  %p1590_p4 = por %p345_p2, %p344_p1 }
  0x11   : > { %s329_s19 = ssub.s32 %s1464_s29, %s1823_s16  ;;  %p1089_p6 = scmp.ge.s32.totalorder %s1468_s30, 1 }
  0x12   : > { %s1802_s18 = scalar_select %p1590_p4, 1, 0 }
  0x13   : > { %p332_p7 = scmp.eq.s32.totalorder %s329_s19, 0  ;;  %p1597_p8 = por %p351_p5, %p350_p3 }
  0x14   : > { %1803 = sst [smem:[#allocation17_spill]] %s1802_s18  ;;  %p358_p9 = scmp.lt.s32.totalorder %s1468_s30, 3 }
  0x15   : > { %s1804_s20 = scalar_select %p1597_p8, 1, 0 }
  0x16   : > { %s1603_s21 = scalar_select %p332_p7, %s1456_s27, %s334_s17  }
  0x17   : > { %1805 = sst [smem:[#allocation18_spill]] %s1804_s20  ;;  %p1605_p10 = pnand %p1089_p6, %p358_p9 }
  0x18   : > { %1806 = sst [smem:[#allocation19_spill]] %s1603_s21  ;;  %p1609_p11 = scmp.eq.s32.totalorder %s1087_s14, 0 }
  0x19   : > { %p1191_p12 = pneg %p1605_p10  ;;  %s1809_s4 = sld [smem:[#allocation20_spill]] }
  0x1a   : > { %s1470_s16 = smov [#allocation5]   ;;  %s1471_s29 = smov 64  }
  0x1b   : > { %p1620_p13 = pnand %p1609_p11, %p1191_p12  ;;  %s388_s14 = sshll.u32 %s1470_s16, 4  ;;  %s389_s14 = int_to_ptr.vmem [resolvable:$true] %s388_s14 }
  0x1c   : > { %s1472_s21 = smov 4   ;;  %s372_s24 = sshll.u32 %s1774_s3, 4  ;;  %s373_s24 = int_to_ptr.hbm [resolvable:$true] %s372_s24 }
  0x1d   : > { %s1473_s15 = smov [#allocation2]   ;;  %s412_s18 = sshll.u32 %s1780_s9, 4  ;;  %s413_s18 = int_to_ptr.hbm [resolvable:$true] %s412_s18 }
  0x1e   : > { %s1474_s16 = smov [#allocation7]  }
  0x1f   : > { %s386_s19 = sshll.u32 %s1809_s4, 4  ;;  %s374_s4 = sshll.u32 %s1473_s15, 4  ;;  %s387_s19 = int_to_ptr.hbm [resolvable:$true] %s386_s19  ;;  %s375_s4 = int_to_ptr.vmem [resolvable:$true] %s374_s4 }
  0x20   : > { %1197 = dma.hbm_to_vmem [thread:$0]  (!%p1620_p13), %s387_s19, 256, %s389_s14, [#allocation6], %s1471_s29, %s1471_s29, %s1472_s21  }
  0x21   : > { %1194 = dma.hbm_to_vmem [thread:$0]  (!%p1620_p13), %s373_s24, 256, %s375_s4, [#allocation3], %s1471_s29, %s1471_s29, %s1472_s21  }
  0x22   : > { %s414_s13 = sshll.u32 %s1474_s16, 4  ;;  %457 = sbr.rel (%p1605_p10) target bundleno = 2173 (0x87d), region = 72  ;;  %s415_s13 = int_to_ptr.vmem [resolvable:$true] %s414_s13 }
  0x23   : > { %1200 = dma.hbm_to_vmem [thread:$0]  (!%p1620_p13), %s413_s18, 256, %s415_s13, [#allocation6], %s1471_s29, %s1471_s29, %s1472_s21  }
  0x27   : > { %1435 = dma.done.wait (%p1609_p11), [#allocation3], 256  }
  0x28   : > { %1437 = vsyncadd (%p1609_p11), [#allocation3], 4294967040 }
  0x29   : > { %1439 = dma.done.wait (%p1609_p11), [#allocation6], 512  }
  0x2a   : > { %1441 = vsyncadd (%p1609_p11), [#allocation6], 4294966784  ;;  %p519_p0 = scmp.lt.s32.totalorder %s1460_s28, 1  ;;  %vm535_vm0 = vcmask 261120   ;;  %v1475_v2 = vmov 32.0   ;;  %v1166_v19 = vld [vmem:[#allocation2 + $0x8] sm:$0xff] }
  0x2b   : > { %1276 = vrcp.f32 %v1475_v2  ;;  %599 = vmatpush.bf16.msra.mxu0 %v1166_v19  ;;  %v1165_v20 = vld [vmem:[#allocation2] sm:$0xff]  ;;  %v1168_v21 = vld [vmem:[%s1773_s2 + $0x8] sm:$0xff]  ;;  %vm671_vm8 = vcmask 130048   ;;  %s1476_s14 = smov 96   ;;  %s1477_s24 = smov 112   ;;  %vm710_vm9 = vcmask 1043456  }
  0x2c   : > { %s1648_s4 = scalar_select %p519_p0, %s1460_s28, 1  ;;  %659 = vmatpush.bf16.msra.mxu1 %v1168_v21  ;;  %v1167_v23 = vld [vmem:[%s1773_s2] sm:$0xff]  ;;  %vm691_vm10 = vcmask 64512   ;;  %vm932_vm14 = vcmask 523264  }
  0x2d   : > { %v1270_v37 = vld [vmem:[%s1776_s5] ss:$0 sm:$0xff]  ;;  %s1478_s15 = smov 80   ;;  %s516_s25 = sand.u32 1, %s1452_s26  }
  0x2e   : > { %s1099_s13 = sshll.u32 %s1648_s4, 3  ;;  %v1271_v41 = vld [vmem:[%s1777_s6] ss:$0 sm:$0xff]  ;;  %s1479_s4 = smov 16  }
  0x2f   : > { %s522_s29 = scalar_lea.vmem %s1771_s0, %s1099_s13  ;;  %600 = vmatpush.bf16.msra.mxu0 %v1165_v20  ;;  %s530_s27 = scalar_lea.vmem %s1772_s1, %s1099_s13 }
  0x30   : > { %v1656_v0 = vld [vmem:[%s522_s29] sm:$0xff]  ;;  %660 = vmatpush.bf16.msra.mxu1 %v1167_v23  ;;  %s1811_s20 = sld [smem:[#allocation21_spill]] }
  0x31   : > { %v536_v1 = vsel %vm535_vm0, %v1656_v0, 0.0  ;;  %v1277_v3 = vpop.eup %1276 }
  0x32   : > { %537 = vadd.xlane.f32.xlu0 %v536_v1  ;;  %v540_v4 = vmul.f32 32.0, %v1277_v3  ;;  %vm544_vm1 = vweird.f32 %v1277_v3 }
  0x34   : > { %v541_v5 = vsub.f32 1.0, %v540_v4  ;;  %v669_v4 = vld [vmem:[%s530_s27] sm:$0xff]   ;;  %s1098_s27 = sshll.u32 %s516_s25, 3 }
  0x35   : > { %v729_v23 = vunpack.c.h.bf16 %v669_v4  ;;  %s518_s23 = scalar_lea.vmem [#allocation8], %s1098_s27 }
  0x36   : > { %v542_v6 = vmul.f32 %v1277_v3, %v541_v5  ;;  %v670_v5 = vunpack.c.l.bf16 %v669_v4  ;;  %s965_s19 = sshll.u32 %s518_s23, 4  ;;  %s1402_s27 = scalar_lea.hbm %s1811_s20, 16  ;;  %s966_s19 = int_to_ptr.vmem [resolvable:$true] %s965_s19 }
  0x38   : > { %v543_v7 = vadd.f32 %v1277_v3, %v542_v6 }
  0x3a   : > { %610 = vadd.xlane.f32.xlu0 %v536_v1  ;;  %v1660_v8 = vsel %vm544_vm1, %v1277_v3, %v543_v7 }
  0xa5   : > { %v538_v9 = vpop.xlane.xlu0 %537 }
  0xa6   : > { %v546_v10 = vmul.f32 %v1660_v8, %v538_v9 }
  0xa8   : > { %v547_v11 = vsub.f32 %v1656_v0, %v546_v10 }
  0xaa   : > { %v548_v12 = vmul.f32 %v547_v11, %v547_v11 }
  0xac   : > { %v549_v13 = vsel %vm535_vm0, %v548_v12, 0.0 }
  0xad   : > { %550 = vadd.xlane.f32.xlu1 %v549_v13  ;;  %v611_v14 = vpop.xlane.xlu0 %610 }
  0xae   : > { %v612_v15 = vmul.f32 %v611_v14, %v1660_v8 }
  0xb0   : > { %v613_v16 = vsub.f32 %v1656_v0, %v612_v15 }
  0xb2   : > { %v614_v17 = vmul.f32 %v613_v16, %v613_v16 }
  0xb4   : > { %v615_v18 = vsel %vm535_vm0, %v614_v17, 0.0 }
  0xb5   : > { %616 = vadd.xlane.f32.xlu1 %v615_v18 }
 0x120   : > { %v551_v22 = vpop.xlane.xlu1 %550 }
 0x121   : > { %v552_v24 = vmul.f32 %v551_v22, %v1660_v8 }
 0x123   : > { %v553_v25 = vadd.f32 1e-05, %v552_v24 }
 0x125   : > { %1278 = vrsqrt.f32 %v553_v25  ;;  %vm560_vm3 = vweird.f32 %v553_v25 }
 0x128   : > { %v617_v26 = vpop.xlane.xlu1 %616 }
 0x129   : > { %v618_v27 = vmul.f32 %v617_v26, %v1660_v8 }
 0x12b   : > { %v1279_v28 = vpop.eup %1278  ;;  %v619_v29 = vadd.f32 1e-05, %v618_v27 }
 0x12c   : > { %v555_v30 = vmul.f32 %v1279_v28, %v553_v25  ;;  %vm561_vm2 = vweird.f32 %v1279_v28 }
 0x12d   : > { %1280 = vrsqrt.f32 %v619_v29  ;;  %vm562_vm4 = vmor %vm560_vm3, %vm561_vm2  ;;  %vm626_vm6 = vweird.f32 %v619_v29 }
 0x12e   : > { %v556_v31 = vmul.f32 %v1279_v28, %v555_v30 }
 0x130   : > { %v557_v32 = vmul.f32 0.5, %v556_v31 }
 0x132   : > { %v558_v33 = vsub.f32 1.5, %v557_v32 }
 0x133   : > { %v1281_v34 = vpop.eup %1280 }
 0x134   : > { %v559_v35 = vmul.f32 %v1279_v28, %v558_v33  ;;  %v621_v36 = vmul.f32 %v1281_v34, %v619_v29  ;;  %vm627_vm5 = vweird.f32 %v1281_v34 }
 0x135   : > { %vm628_vm7 = vmor %vm626_vm6, %vm627_vm5 }
 0x136   : > { %v563_v38 = vsel %vm562_vm4, %v1279_v28, %v559_v35  ;;  %v622_v39 = vmul.f32 %v1281_v34, %v621_v36 }
 0x137   : > { %v564_v40 = vmul.f32 %v563_v38, %v547_v11  ;;  %v1169_v38 = vld [vmem:[#allocation5] sm:$0xff] }
 0x138   : > { %v623_v42 = vmul.f32 0.5, %v622_v39 }
 0x139   : > { %v568_v43 = vmul.f32 %v1270_v37, %v564_v40 }
 0x13a   : > { %v624_v44 = vsub.f32 1.5, %v623_v42 }
 0x13b   : > { %v572_v45 = vadd.f32 %v1271_v41, %v568_v43 }
 0x13c   : > { %v625_v46 = vmul.f32 %v1281_v34, %v624_v44 }
 0x13d   : > { %v573_v47 = vpack.c.bf16 %v572_v45, %v572_v45 }
 0x13e   : > { %v629_v48 = vsel %vm628_vm7, %v1281_v34, %v625_v46 }
 0x13f   : > { %1110 = vmatmul.msk.bf16.vlgmr.msra.gmra.mxu0 %vm535_vm0, %v573_v47  ;;  %v630_v49 = vmul.f32 %v629_v48, %v613_v16 }
 0x141   : > { %v631_v50 = vmul.f32 %v1270_v37, %v630_v49  ;;  %v1170_v37 = vld [vmem:[#allocation5 + $0x8] sm:$0xff] }
 0x142   : > { %818 = vmatpush.bf16.msrb.mxu1 %v1170_v37 }
 0x143   : > { %v632_v51 = vadd.f32 %v1271_v41, %v631_v50 }
 0x145   : > { %v633_v52 = vpack.c.bf16 %v632_v51, %v632_v51 }
 0x146   : > { %819 = vmatpush.bf16.msrb.mxu1 %v1169_v38 }
 0x147   : > { %1119 = vmatmul.msk.bf16.vlgmr.msra.gmra.mxu1 %vm535_vm0, %v633_v52 }
 0x1bc   : > { %v602_v53 = vpop.f32.mrf.mxu0 }
 0x1bd   : > { %v668_v54 = vpack.c.bf16 %v602_v53, %v602_v53  ;;  %v1172_v53 = vld [vmem:[#allocation7 + $0x8] sm:$0xff] }
 0x1bf   : > { %705 = vrot.lane.b32.xlu0 %v668_v54, %s1476_s14  ;;  %733 = vrot.lane.b32.xlu1 %v668_v54, %s1477_s24  ;;  %v676_v55 = vsel %vm671_vm8, %v668_v54, 0 }
 0x1c0   : > { %685 = vmatpush.bf16.xpose.msra.mxu2 %v676_v55 }
 0x1c4   : > { %v604_v56 = vpop.f32.mrf.mxu0  ;;  %v662_v57 = vpop.f32.mrf.mxu1 }
 0x1c5   : > { %v666_v58 = vmul.f32 0.17677669, %v662_v57  ;;  %v1175_v57 = vld [vmem:[%s1782_s11 + $0x10] sm:$0xff] }
 0x1c7   : > { %v667_v59 = vpack.c.bf16 %v666_v58, %v666_v58  ;;  %766 = vrot.lane.b32.xlu1 %v668_v54, %s1478_s15  ;;  %v1171_v54 = vld [vmem:[#allocation7] sm:$0xff] }
 0x1c8   : > { %887 = vmatpush.bf16.msrb.mxu2 %v1172_v53 }
 0x1c9   : > { %1120 = vmatmul.msk.bf16.vlgmr.msra.gmra.mxu2 %vm671_vm8, %v667_v59 }
 0x1cc   : > { %v664_v60 = vpop.f32.mrf.mxu1  ;;  %888 = vmatpush.bf16.msrb.mxu2 %v1171_v54 }
 0x231   : > { %v734_v61 = vpop.permute.xlu1 %733  ;;  %v706_v62 = vpop.permute.xlu0 %705 }
 0x232   : > { %v712_v63 = vsel %vm710_vm9, %v706_v62, 0  ;;  %v739_v1 = vsel %vm671_vm8, %v734_v61, 0 }
 0x233   : > { %721 = vmatpush.bf16.msra.mxu3 %v712_v63 }
 0x237   : > { %748 = vmatpush.bf16.xpose.msrb.mxu3 %v739_v1 }
 0x239   : > { %v767_v2 = vpop.permute.xlu1 %766 }
 0x23a   : > { %v772_v3 = vsel %vm710_vm9, %v767_v2, 0  ;;  %v1272_v2 = vld [vmem:[%s1778_s7] ss:$0 sm:$0xff] }
 0x23b   : > { %781 = vmatpush.bf16.msrb.mxu0 %v772_v3 }
 0x24c   : > { %v687_v6 = vpop.f32.mrf.mxu2 }
 0x24d   : > { %v688_v7 = vadd.f32 %v687_v6, %v670_v5  ;;  %v1273_v5 = vld [vmem:[%s1779_s8] ss:$0 sm:$0xff] }
 0x24f   : > { %v692_v9 = vsel %vm691_vm10, %v688_v7, -inf }
 0x250   : > { %693 = vmax.xlane.f32.xlu2 %v692_v9 }
 0x254   : > { %v689_v10 = vpop.f32.mrf.mxu2 }
 0x255   : > { %v1173_v10 = vld [vmem:[%s1782_s11] sm:$0xff] }
 0x2c3   : > { %v694_v11 = vpop.xlane.xlu2 %693 }
 0x2c4   : > { %v695_v12 = vsub.f32 %v688_v7, %v694_v11  ;;  %v1274_v11 = vld [vmem:[%s1781_s10] ss:$0 sm:$0xff] }
 0x2c6   : > { %v696_v13 = vmul.f32 1.442695, %v695_v12 }
 0x2c8   : > { %1282 = vpow2.f32 %v696_v13 }
 0x2ce   : > { %v1283_v14 = vpop.eup %1282 }
 0x2cf   : > { %v698_v15 = vsel %vm691_vm10, %v1283_v14, 0.0 }
 0x2d0   : > { %699 = vadd.xlane.f32.xlu2 %v698_v15 }
 0x2e8   : > { %731 = vrot.lane.b32.xlu2 %v667_v59, %s1477_s24  ;;  %v1174_v59 = vld [vmem:[%s1782_s11 + $0x8] sm:$0xff] }
 0x343   : > { %v700_v16 = vpop.xlane.xlu2 %699 }
 0x344   : > { %1284 = vrcp.f32 %v700_v16 }
 0x34a   : > { %v1285_v17 = vpop.eup %1284 }
 0x34b   : > { %v702_v18 = vmul.f32 %v1285_v17, %v1283_v14  ;;  %v732_v20 = vpop.permute.xlu2 %731  ;;  %v1275_v17 = vld [vmem:[%s1783_s12] ss:$0 sm:$0xff] }
 0x34d   : > { %v703_v19 = vpack.c.bf16 %v702_v18, %v702_v18 }
 0x34f   : > { %1121 = vmatmul.msk.bf16.vlgmr.msra.gmra.mxu3 %vm691_vm10, %v703_v19 }
 0x35f   : > { %1123 = vmatmul.msk.bf16.vlgmr.msrb.gmra.mxu3 %vm671_vm8, %v732_v20 }
 0x3d2   : > { %v723_v21 = vpop.f32.mrf.mxu3 }
 0x3da   : > { %v725_v22 = vpop.f32.mrf.mxu3 }
 0x3e2   : > { %v750_v24 = vpop.f32.mrf.mxu3 }
 0x3e3   : > { %v751_v25 = vadd.f32 %v750_v24, %v729_v23 }
 0x3e5   : > { %v754_v26 = vsel %vm691_vm10, %v751_v25, -inf }
 0x3e6   : > { %755 = vmax.xlane.f32.xlu0 %v754_v26 }
 0x3ea   : > { %v752_v27 = vpop.f32.mrf.mxu3 }
 0x459   : > { %v756_v28 = vpop.xlane.xlu0 %755 }
 0x45a   : > { %v757_v29 = vsub.f32 %v751_v25, %v756_v28 }
 0x45c   : > { %v758_v30 = vmul.f32 1.442695, %v757_v29 }
 0x45e   : > { %1286 = vpow2.f32 %v758_v30 }
 0x464   : > { %v1287_v31 = vpop.eup %1286 }
 0x465   : > { %v760_v32 = vsel %vm691_vm10, %v1287_v31, 0.0 }
 0x466   : > { %761 = vadd.xlane.f32.xlu2 %v760_v32 }
 0x4d9   : > { %v762_v33 = vpop.xlane.xlu2 %761 }
 0x4da   : > { %1288 = vrcp.f32 %v762_v33 }
 0x4e0   : > { %v1289_v34 = vpop.eup %1288 }
 0x4e1   : > { %v764_v35 = vmul.f32 %v1289_v34, %v1287_v31 }
 0x4e3   : > { %v765_v36 = vpack.c.bf16 %v764_v35, %v764_v35 }
 0x4e5   : > { %1124 = vmatmul.msk.bf16.vlgmr.msrb.gmra.mxu0 %vm691_vm10, %v765_v36 }
 0x562   : > { %v783_v39 = vpop.f32.mrf.mxu0 }
 0x563   : > { %788 = vrot.lane.b32.xlu1 %v783_v39, %s1479_s4  ;;  %s1161_s4 = sshll.u32 %s1460_s28, 3  ;;  %s952_s28 = scalar_lea.sflag [#allocation4], %s516_s25 }
 0x564   : > { %s963_s22 = scalar_lea.hbm %s1811_s20, %s1161_s4 }
 0x565   : > { %s967_s17 = sshll.u32 %s963_s22, 4  ;;  %s968_s17 = int_to_ptr.hbm [resolvable:$true] %s967_s17 }
 0x566   : > { %s1396_s14 = sshra.s32 %s968_s17, 4  ;;  %s1397_s14 = int_to_ptr.hbm [resolvable:$true] %s1396_s14 }
 0x567   : > { %s1398_s24 = scalar_lea.hbm %s1397_s14, 8  ;;  %p1403_p5 = scmp.lt.s32.totalorder %s1397_s14, %s1811_s20 }
 0x568   : > { %p1399_p1 = scmp.ne.s32.totalorder %s1397_s14, %s1398_s24  ;;  %p1404_p6 = scmp.lt.s32.totalorder %s1402_s27, %s1398_s24 }
 0x56a   : > { %v785_v40 = vpop.f32.mrf.mxu0  ;;  %p1400_p2 = pnand %p1399_p1, %p1590_p4  ;;  %p1405_p7 = por %p1404_p6, %p1403_p5 }
 0x56c   : > { %p1401_p3 = pneg %p1400_p2 }
 0x56e   : > { %p1406_p9 = pnand %p1405_p7, %p1401_p3 }
 0x5d5   : > { %v789_v41 = vpop.permute.xlu1 %788 }
 0x5d6   : > { %v791_v42 = vsel %vm671_vm8, %v723_v21, %v789_v41 }
 0x5d7   : > { %v792_v43 = vpack.c.bf16 %v791_v42, %v791_v42 }
 0x5d9   : > { %1133 = vmatmul.msk.bf16.vlgmr.msrb.gmra.mxu1 %vm535_vm0, %v792_v43 }
 0x656   : > { %v821_v44 = vpop.f32.mrf.mxu1 }
 0x657   : > { %v822_v45 = vadd.f32 %v821_v44, %v1656_v0  ;;  %v1176_v0 = vld [vmem:[%s1782_s11 + $0x18] sm:$0xff] }
 0x658   : > { %940 = vmatpush.bf16.msra.mxu3 %v1176_v0 }
 0x659   : > { %v827_v46 = vsel %vm535_vm0, %v822_v45, 0.0 }
 0x65a   : > { %828 = vadd.xlane.f32.xlu1 %v827_v46 }
 0x65c   : > { %941 = vmatpush.bf16.msra.mxu3 %v1175_v57 }
 0x65e   : > { %v823_v47 = vpop.f32.mrf.mxu1 }
 0x660   : > { %942 = vmatpush.bf16.msra.mxu3 %v1174_v59 }
 0x664   : > { %943 = vmatpush.bf16.msra.mxu3 %v1173_v10 }
 0x6cd   : > { %v829_v48 = vpop.xlane.xlu1 %828 }
 0x6ce   : > { %v830_v49 = vmul.f32 %v829_v48, %v1660_v8 }
 0x6d0   : > { %v831_v50 = vsub.f32 %v822_v45, %v830_v49 }
 0x6d2   : > { %v832_v51 = vmul.f32 %v831_v50, %v831_v50 }
 0x6d4   : > { %v833_v52 = vsel %vm535_vm0, %v832_v51, 0.0 }
 0x6d5   : > { %834 = vadd.xlane.f32.xlu0 %v833_v52 }
 0x748   : > { %v835_v55 = vpop.xlane.xlu0 %834 }
 0x749   : > { %v836_v56 = vmul.f32 %v835_v55, %v1660_v8 }
 0x74b   : > { %v837_v58 = vadd.f32 1e-05, %v836_v56 }
 0x74d   : > { %1290 = vrsqrt.f32 %v837_v58  ;;  %vm844_vm12 = vweird.f32 %v837_v58 }
 0x753   : > { %v1291_v60 = vpop.eup %1290 }
 0x754   : > { %v839_v61 = vmul.f32 %v1291_v60, %v837_v58  ;;  %vm845_vm11 = vweird.f32 %v1291_v60 }
 0x755   : > { %vm846_vm13 = vmor %vm844_vm12, %vm845_vm11 }
 0x756   : > { %v840_v62 = vmul.f32 %v1291_v60, %v839_v61 }
 0x758   : > { %v841_v63 = vmul.f32 0.5, %v840_v62 }
 0x75a   : > { %v842_v1 = vsub.f32 1.5, %v841_v63 }
 0x75c   : > { %v843_v8 = vmul.f32 %v1291_v60, %v842_v1 }
 0x75e   : > { %v847_v3 = vsel %vm846_vm13, %v1291_v60, %v843_v8 }
 0x75f   : > { %v848_v4 = vmul.f32 %v847_v3, %v831_v50 }
 0x761   : > { %v852_v6 = vmul.f32 %v1272_v2, %v848_v4 }
 0x763   : > { %v856_v7 = vadd.f32 %v1273_v5, %v852_v6 }
 0x765   : > { %v857_v9 = vpack.c.bf16 %v856_v7, %v856_v7 }
 0x767   : > { %1142 = vmatmul.msk.bf16.vlgmr.msrb.gmra.mxu2 %vm535_vm0, %v857_v9 }
 0x7ea   : > { %v890_v12 = vpop.f32.mrf.mxu2 }
 0x7eb   : > { %v891_v13 = vadd.f32 %v1274_v11, %v890_v12 }
 0x7ed   : > { %v894_v14 = vmax.f32 %v891_v13, 0.0 }
 0x7ef   : > { %v895_v15 = vpack.c.bf16 %v894_v14, %v894_v14 }
 0x7f1   : > { %1159 = vmatmul.msk.bf16.vlgmr.msra.gmra.mxu3 %vm932_vm14, %v895_v15 }
 0x7f2   : > { %v892_v16 = vpop.f32.mrf.mxu2 }
 0x874   : > { %v945_v18 = vpop.f32.mrf.mxu3 }
 0x875   : > { %v946_v19 = vadd.f32 %v1275_v17, %v945_v18 }
 0x877   : > { %v949_v20 = vadd.f32 %v946_v19, %v822_v45 }
 0x879   : > { %950 = vst.msk [vmem:[%s518_s23] sm:$0xff] %vm535_vm0, %v949_v20 }
 0x87a   : > { %1409 = shalt.err (!%p1406_p9)
}
 0x87b   : > { %1189 = dma.vmem_to_hbm [thread:$0]  (%p1590_p4), %s966_s19, 128, %s968_s17, %s952_s28  }
 0x87c   : > { %v947_v21 = vpop.f32.mrf.mxu3 }
 0x87d PF: > { %s1813_s25 = sld [smem:[#allocation15_spill]] }
 0x87e   : > { %s1814_s29 = sld [smem:[#allocation12_spill]] }
 0x883   : > { %p1211_p10 = scmp.ge.s32.totalorder %s1813_s25, 2 }
 0x884   : > { %s979_s18 = sand.u32 1, %s1814_s29  }
 0x885   : > { %p1202_p11 = pnand %p1211_p10, %p1597_p8  ;;  %s980_s22 = scalar_lea.sflag [#allocation4], %s979_s18 }
 0x887   : > { %p1203_p12 = pneg %p1202_p11 }
 0x889   : > { %1443 = dma.done.wait (%p1203_p12), %s980_s22, 128  }
 0x88a   : > { %1445 = vsyncadd (%p1203_p12), %s980_s22, 4294967168  ;;  %s28_s30 = sadd.s32 1, %s1813_s25   ;;  %s1816_s23 = sld [smem:[#allocation13_spill]] }
 0x88b   : > { %p25_p13 = scmp.ge.s32.totalorder %s28_s30, 4   ;;  %s1817_s27 = sld [smem:[#allocation19_spill]] }
 0x88c   : > { %s1818_s28 = sld [smem:[#allocation14_spill]]  ;;  %s1820_s25 = smov %s1452_s26 }
 0x88d   : > { %s1819_s29 = sld [smem:[#allocation16_spill]]  ;;  %27 = sbr.rel (!%p25_p13) target bundleno = 9 (0x9), region = 125 }
 0x890   : > { %s1821_s26 = smov %s1816_s23 }
 0x892   :  { %986 = vsyncpa [#allocation3], 1 }
 0x893   :  { %988 = vsyncpa [#allocation3 + $0x1], 1 }
 0x894   :  { %989 = vsyncpa [#allocation6], 1 }
 0x895   :  { %990 = vsyncpa [#allocation4], 1 }
 0x896   :  { %992 = vsyncpa [#allocation4 + $0x1], 1 }

</bundles_post_ra>
